<compile_context>
chip_gen: v7x
topology: tpu7x:2x2x1
jax: 0.10.0
libtpu: 0.0.40
codegen_flags: <defaults>
</compile_context>

<pallas_src>
import jax
import jax.numpy as jnp
from jax import lax
from jax.experimental import pallas as pl
from jax.experimental.pallas import tpu as pltpu


# ---------------------------------------------------------------------------
# Pallas kernel: tiled (tm, K) @ (K, Coutp) matmul + folded-BN bias + ReLU.
# Grid = (M tiles [parallel], K tiles [arbitrary, reduction]).
# ---------------------------------------------------------------------------
def _conv_bn_relu_kernel(a_ref, w_ref, bias_ref, o_ref, acc_ref):
    k = pl.program_id(1)

    @pl.when(k == 0)
    def _():
        acc_ref[...] = jnp.zeros_like(acc_ref)

    acc_ref[...] += jnp.dot(a_ref[...], w_ref[...],
                            preferred_element_type=jnp.float32)

    @pl.when(k == pl.num_programs(1) - 1)
    def _():
        o_ref[...] = jnp.maximum(acc_ref[...] + bias_ref[...],
                                 0.0).astype(o_ref.dtype)


def _round_up(x, m):
    return ((x + m - 1) // m) * m


def _im2col_3d(x, ksize, stride, padding):
    # x layout: NCDHW (any dtype; caller passes bf16 to halve HBM traffic).
    N, C, D, H, W = x.shape
    kd, kh, kw = ksize
    sd, sh, sw = stride
    pd, ph, pw = padding
    xp = jnp.pad(x, ((0, 0), (0, 0), (pd, pd), (ph, ph), (pw, pw)))
    Do = (D + 2 * pd - kd) // sd + 1
    Ho = (H + 2 * ph - kh) // sh + 1
    Wo = (W + 2 * pw - kw) // sw + 1
    cols = []
    for dz in range(kd):
        for dy in range(kh):
            for dx in range(kw):
                cols.append(xp[:, :,
                               dz: dz + sd * Do: sd,
                               dy: dy + sh * Ho: sh,
                               dx: dx + sw * Wo: sw])
    # (kd*kh*kw, N, C, Do, Ho, Wo) -> (N, Do, Ho, Wo, C, kd*kh*kw)
    patches = jnp.stack(cols, axis=0)
    patches = jnp.transpose(patches, (1, 3, 4, 5, 2, 0))
    patches = patches.reshape(N * Do * Ho * Wo, C * kd * kh * kw)
    return patches, (Do, Ho, Wo)


def _choose_tiles(M, Kp, Coutp, out_itemsize, budget_bytes=20 * 1024 * 1024):
    """Pick (tm, tk) so double-buffered tiles + accumulator fit a VMEM budget."""
    tk = min(Kp, 512)
    tm = 128
    for cand in (1024, 512, 256, 128):
        use = (2 * cand * tk * 2                     # A tile (bf16), x2 buffers
               + 2 * tk * Coutp * 2                  # W tile (bf16), x2 buffers
               + 2 * cand * Coutp * out_itemsize     # out tile, x2 buffers
               + cand * Coutp * 4)                   # f32 accumulator scratch
        if use <= budget_bytes:
            tm = cand
            break
    # keep >= 2 M-steps so both v7x TensorCores get work
    while tm > 128 and -(-M // tm) < 2:
        tm //= 2
    return tm, tk


def basic_conv3d(x, weight, gamma, beta, running_mean, running_var, *,
                 stride=(1, 1, 1), padding=(0, 0, 0), eps=1e-3):
    """Conv3d(bias=False) + BatchNorm3d(eval) + ReLU.  x: NCDHW, weight: OIDHW."""
    out_dtype = x.dtype
    N, Cin, D, H, W = x.shape
    Cout = weight.shape[0]
    ksize = tuple(int(s) for s in weight.shape[2:])
    stride = tuple(int(s) for s in stride)
    padding = tuple(int(p) for p in padding)

    # bf16 operands for the MXU (f32 accumulation inside the kernel) and to
    # halve the HBM traffic of the im2col glue.
    xb = x.astype(jnp.bfloat16)

    if ksize == (1, 1, 1) and padding == (0, 0, 0):
        # 1x1x1 fast path: no im2col, just a strided slice + channels-last view.
        sd, sh, sw = stride
        xs = xb[:, :, ::sd, ::sh, ::sw]
        Do, Ho, Wo = xs.shape[2], xs.shape[3], xs.shape[4]
        patches = jnp.transpose(xs, (0, 2, 3, 4, 1)).reshape(N * Do * Ho * Wo, Cin)
    else:
        patches, (Do, Ho, Wo) = _im2col_3d(xb, ksize, stride, padding)

    M, K = patches.shape

    # Fold eval-mode BN into a per-channel affine; fold the scale into the
    # weight columns so the kernel only adds a bias and applies ReLU.
    scale = (gamma / jnp.sqrt(running_var + eps)).astype(jnp.float32)   # (Cout,)
    bias = (beta - running_mean * scale).astype(jnp.float32)            # (Cout,)
    w_mat = weight.astype(jnp.float32).reshape(Cout, K).T * scale[None, :]

    # Lane alignment: pad K and Cout to multiples of 128; pad M to tile multiple.
    Kp = _round_up(K, 128)
    Coutp = _round_up(Cout, 128)
    out_itemsize = jnp.dtype(out_dtype).itemsize
    tm, tk = _choose_tiles(M, Kp, Coutp, out_itemsize)
    Mp = _round_up(M, tm)

    patches = jnp.pad(patches, ((0, Mp - M), (0, Kp - K)))
    w_mat = jnp.pad(w_mat, ((0, Kp - K), (0, Coutp - Cout))).astype(jnp.bfloat16)
    bias_p = jnp.pad(bias, (0, Coutp - Cout)).reshape(1, Coutp)

    grid = (Mp // tm, Kp // tk)
    cost = pl.CostEstimate(
        flops=2 * Mp * Kp * Coutp,
        transcendentals=0,
        bytes_accessed=Mp * Kp * 2 + Kp * Coutp * 2 + Mp * Coutp * out_itemsize)

    out = pl.pallas_call(
        _conv_bn_relu_kernel,
        out_shape=jax.ShapeDtypeStruct((Mp, Coutp), out_dtype),
        grid_spec=pltpu.PrefetchScalarGridSpec(
            num_scalar_prefetch=0,
            grid=grid,
            in_specs=[
                pl.BlockSpec((tm, tk), lambda i, k: (i, k)),      # im2col tile
                pl.BlockSpec((tk, Coutp), lambda i, k: (k, 0)),   # scaled weights
                pl.BlockSpec((1, Coutp), lambda i, k: (0, 0)),    # folded BN bias
            ],
            out_specs=pl.BlockSpec((tm, Coutp), lambda i, k: (i, 0)),
            scratch_shapes=[pltpu.VMEM((tm, Coutp), jnp.float32)],
        ),
        compiler_params=pltpu.CompilerParams(
            dimension_semantics=("parallel", "arbitrary"),
            vmem_limit_bytes=40 * 1024 * 1024),
        cost_estimate=cost,
    )(patches, w_mat, bias_p)

    out = out[:M, :Cout].reshape(N, Do, Ho, Wo, Cout)
    return jnp.transpose(out, (0, 4, 1, 2, 3))  # back to NCDHW


# ---------------------------------------------------------------------------
# Inception block (GoogLeNet) built from the Pallas conv + a JAX max-pool.
# ---------------------------------------------------------------------------
def max_pool3d(x, ksize, stride, padding):
    return lax.reduce_window(
        x, jnp.array(-jnp.inf, x.dtype), lax.max,
        window_dimensions=(1, 1) + tuple(ksize),
        window_strides=(1, 1) + tuple(stride),
        padding=((0, 0), (0, 0)) + tuple((p, p) for p in padding))


def _apply(conv_fn, x, p, padding=(0, 0, 0)):
    return conv_fn(x, p["weight"], p["gamma"], p["beta"], p["mean"], p["var"],
                   padding=padding, eps=1e-3)


def inception(x, params, conv_fn):
    b1 = _apply(conv_fn, x, params["b1"])
    b2 = _apply(conv_fn, _apply(conv_fn, x, params["b2_red"]), params["b2"],
                padding=(1, 1, 1))
    b3 = _apply(conv_fn, _apply(conv_fn, x, params["b3_red"]), params["b3"],
                padding=(1, 1, 1))
    b4 = _apply(conv_fn, max_pool3d(x, (3, 3, 3), (1, 1, 1), (1, 1, 1)),
                params["b4"])
    return jnp.concatenate([b1, b2, b3, b4], axis=1)


# ---------------------------------------------------------------------------
# Plain-JAX reference (f32, HIGHEST precision) for correctness checks.
# ---------------------------------------------------------------------------
def ref_basic_conv3d(x, weight, gamma, beta, running_mean, running_var, *,
                     stride=(1, 1, 1), padding=(0, 0, 0), eps=1e-3):
    y = lax.conv_general_dilated(
        x, weight, window_strides=stride,
        padding=[(p, p) for p in padding],
        dimension_numbers=("NCDHW", "OIDHW", "NCDHW"),
        precision=lax.Precision.HIGHEST)
    scale = gamma / jnp.sqrt(running_var + eps)
    bias = beta - running_mean * scale
    return jnp.maximum(y * scale.reshape(1, -1, 1, 1, 1)
                       + bias.reshape(1, -1, 1, 1, 1), 0.0)


def _make_conv_params(key, cin, cout, ksize):
    kw_, kg, kb, km, kv = jax.random.split(key, 5)
    return dict(
        weight=jax.random.normal(kw_, (cout, cin) + ksize, jnp.float32) * 0.1,
        gamma=jax.random.uniform(kg, (cout,), minval=0.5, maxval=1.5),
        beta=jax.random.normal(kb, (cout,)) * 0.1,
        mean=jax.random.normal(km, (cout,)) * 0.1,
        var=jax.random.uniform(kv, (cout,), minval=0.5, maxval=1.5),
    )


if __name__ == "__main__":
    key = jax.random.PRNGKey(0)
    k_x, k_c, k_i = jax.random.split(key, 3)

    N, Cin = 2, 4
    D = H = W = 8
    x = jax.random.normal(k_x, (N, Cin, D, H, W), jnp.float32)

    # --- 1. single BasicConv3d, 3x3x3, padding 1 (general im2col path) -------
    p = _make_conv_params(k_c, Cin, 8, (3, 3, 3))
    y = _apply(basic_conv3d, x, p, padding=(1, 1, 1))
    y = jax.block_until_ready(y)
    y_ref = _apply(ref_basic_conv3d, x, p, padding=(1, 1, 1))
    assert y.shape == y_ref.shape == (N, 8, D, H, W), (y.shape, y_ref.shape)
    err = float(jnp.max(jnp.abs(y - y_ref)))
    # bf16 matmul operands with f32 accumulation -> loose tolerance vs f32 ref.
    assert jnp.allclose(y, y_ref, rtol=2e-2, atol=2e-2), err

    # --- 2. small Inception block (1x1 fast path + 3x3 path + pool branch) ---
    keys = jax.random.split(k_i, 6)
    inc_params = {
        "b1":     _make_conv_params(keys[0], Cin, 8, (1, 1, 1)),
        "b2_red": _make_conv_params(keys[1], Cin, 4, (1, 1, 1)),
        "b2":     _make_conv_params(keys[2], 4, 8, (3, 3, 3)),
        "b3_red": _make_conv_params(keys[3], Cin, 4, (1, 1, 1)),
        "b3":     _make_conv_params(keys[4], 4, 8, (3, 3, 3)),
        "b4":     _make_conv_params(keys[5], Cin, 8, (1, 1, 1)),
    }
    z = inception(x, inc_params, basic_conv3d)
    z = jax.block_until_ready(z)
    z_ref = inception(x, inc_params, ref_basic_conv3d)
    assert z.shape == z_ref.shape == (N, 32, D, H, W), (z.shape, z_ref.shape)
    errz = float(jnp.max(jnp.abs(z - z_ref)))
    assert jnp.allclose(z, z_ref, rtol=5e-2, atol=5e-2), errz

    print("KERNEL_OK")
</pallas_src>

<mosaic_0001>
module attributes {stable_mosaic.version = 11 : i64} {
  func.func @_conv_bn_relu_kernel(%arg0: i32, %arg1: i32, %arg2: memref<512x128xbf16, #tpu.memory_space<vmem>>, %arg3: memref<128x128xbf16, #tpu.memory_space<vmem>>, %arg4: memref<1x128xf32, #tpu.memory_space<vmem>>, %arg5: memref<512x128xf32, #tpu.memory_space<vmem>>, %arg6: memref<512x128xf32, #tpu.memory_space<vmem>>) attributes {dimension_semantics = [#tpu.dimension_semantics<parallel>, #tpu.dimension_semantics<arbitrary>], iteration_bounds = array<i64: 2, 1>, scalar_prefetch = 0 : i64, scratch_operands = 1 : i64, tpu.core_type = #tpu.core_type<tc>, window_params = [{transform_indices = @transform_0, window_bounds = array<i64: 512, 128>}, {transform_indices = @transform_1, window_bounds = array<i64: 128, 128>}, {pipeline_mode = #tpu.pipeline_mode<synchronous>, transform_indices = @transform_2, window_bounds = array<i64: 1, 128>}, {transform_indices = @transform_3, window_bounds = array<i64: 512, 128>}]} {
    %c0_i32 = arith.constant 0 : i32
    %0 = arith.cmpi eq, %arg1, %c0_i32 : i32
    %1 = arith.extui %0 : i1 to i32
    %c0_i32_0 = arith.constant 0 : i32
    %2 = arith.cmpi ne, %1, %c0_i32_0 : i32
    scf.if %2 {
      %cst_10 = arith.constant 0.000000e+00 : f32
      %12 = vector.broadcast %cst_10 : f32 to vector<512x128xf32>
      %c0_11 = arith.constant 0 : index
      %c0_12 = arith.constant 0 : index
      %13 = vector.load %arg6[%c0_11, %c0_12] : memref<512x128xf32, #tpu.memory_space<vmem>>, vector<512x128xf32>
      tpu.vector_store %arg6[%c0_11, %c0_12], %12 {strides = array<i32>} : memref<512x128xf32, #tpu.memory_space<vmem>>, vector<512x128xf32>,
    } else {
    }
    %c0 = arith.constant 0 : index
    %c0_1 = arith.constant 0 : index
    %3 = vector.load %arg6[%c0, %c0_1] : memref<512x128xf32, #tpu.memory_space<vmem>>, vector<512x128xf32>
    %c0_2 = arith.constant 0 : index
    %c0_3 = arith.constant 0 : index
    %4 = vector.load %arg2[%c0_2, %c0_3] : memref<512x128xbf16, #tpu.memory_space<vmem>>, vector<512x128xbf16>
    %c0_4 = arith.constant 0 : index
    %c0_5 = arith.constant 0 : index
    %5 = vector.load %arg3[%c0_4, %c0_5] : memref<128x128xbf16, #tpu.memory_space<vmem>>, vector<128x128xbf16>
    %cst = arith.constant dense<0.000000e+00> : vector<512x128xf32>
    %6 = tpu.matmul %4, %5, %cst {dimension_numbers = #tpu.dot_dimension_numbers<[1], [0], [0], [1], [0, 0, 1, 1], [], []>} : vector<512x128xbf16>, vector<128x128xbf16>, vector<512x128xf32> -> vector<512x128xf32>
    %7 = arith.addf %3, %6 : vector<512x128xf32>
    %c0_6 = arith.constant 0 : index
    %c0_7 = arith.constant 0 : index
    %8 = vector.load %arg6[%c0_6, %c0_7] : memref<512x128xf32, #tpu.memory_space<vmem>>, vector<512x128xf32>
    tpu.vector_store %arg6[%c0_6, %c0_7], %7 {strides = array<i32>} : memref<512x128xf32, #tpu.memory_space<vmem>>, vector<512x128xf32>,
    %c0_i32_8 = arith.constant 0 : i32
    %9 = arith.cmpi eq, %arg1, %c0_i32_8 : i32
    %10 = arith.extui %9 : i1 to i32
    %c0_i32_9 = arith.constant 0 : i32
    %11 = arith.cmpi ne, %10, %c0_i32_9 : i32
    scf.if %11 {
      %c0_10 = arith.constant 0 : index
      %c0_11 = arith.constant 0 : index
      %12 = vector.load %arg6[%c0_10, %c0_11] : memref<512x128xf32, #tpu.memory_space<vmem>>, vector<512x128xf32>
      %c0_12 = arith.constant 0 : index
      %c0_13 = arith.constant 0 : index
      %13 = vector.load %arg4[%c0_12, %c0_13] : memref<1x128xf32, #tpu.memory_space<vmem>>, vector<1x128xf32>
      %14 = vector.broadcast %13 : vector<1x128xf32> to vector<512x128xf32>
      %15 = arith.addf %12, %14 : vector<512x128xf32>
      %cst_14 = arith.constant 0.000000e+00 : f32
      %16 = vector.broadcast %cst_14 : f32 to vector<512x128xf32>
      %17 = arith.maximumf %15, %16 : vector<512x128xf32>
      %c0_15 = arith.constant 0 : index
      %c0_16 = arith.constant 0 : index
      %18 = vector.load %arg5[%c0_15, %c0_16] : memref<512x128xf32, #tpu.memory_space<vmem>>, vector<512x128xf32>
      tpu.vector_store %arg5[%c0_15, %c0_16], %17 {strides = array<i32>} : memref<512x128xf32, #tpu.memory_space<vmem>>, vector<512x128xf32>,
    } else {
    }
    return
  }
  func.func @transform_0(%arg0: i32, %arg1: i32) -> (i32, i32) {
    %c0_i32 = arith.constant 0 : i32
    return %arg0, %arg1 : i32, i32
  }
  func.func @transform_1(%arg0: i32, %arg1: i32) -> (i32, i32) {
    %c0_i32 = arith.constant 0 : i32
    %c0_i32_0 = arith.constant 0 : i32
    return %arg1, %c0_i32 : i32, i32
  }
  func.func @transform_2(%arg0: i32, %arg1: i32) -> (i32, i32) {
    %c0_i32 = arith.constant 0 : i32
    %c0_i32_0 = arith.constant 0 : i32
    %c0_i32_1 = arith.constant 0 : i32
    return %c0_i32, %c0_i32_0 : i32, i32
  }
  func.func @transform_3(%arg0: i32, %arg1: i32) -> (i32, i32) {
    %c0_i32 = arith.constant 0 : i32
    %c0_i32_0 = arith.constant 0 : i32
    return %arg0, %c0_i32 : i32, i32
  }
}

</mosaic_0001>

<bundles_post_ra>
// kernel: tpu_custom_call.1
= control target key start
LH: loop header
LB: loop body
LE: loop exit
PB: predicated region body
PF: predicated region fallthrough
CT: control target
= control target key end

     0   :  { %8 = vsyncpa [#allocation4], 0  ;;  %s2357_s0 = inlined_call_operand.hbm [shape: bf16[1024,128], index: 0, kind: input, shape index: {}]   ;;  %s2358_s1 = inlined_call_operand.hbm [shape: bf16[128,128], index: 1, kind: input, shape index: {}]   ;;  %s2359_s2 = inlined_call_operand.vmem [shape: f32[1,128], index: 2, kind: input, shape index: {}]   ;;  %s2360_s3 = inlined_call_operand.hbm [shape: f32[1024,128], index: 3, kind: output, shape index: {}]  }
   0x1   :  { %10 = vsyncpa [#allocation4 + $0x1], 0 }
   0x2   :  { %11 = vsyncpa [#allocation7], 0 }
   0x3   :  { %12 = vsyncpa [#allocation5], 0 }
   0x4   :  { %14 = vsyncpa [#allocation5 + $0x1], 0  ;;  %s1961_s12 = smov 0   ;;  %s1963_s13 = smov 0  }
   0x5   :  { %s1965_s14 = smov 0   ;;  %s1967_s15 = smov 0  }
   0x6   :  { %s1969_s16 = smov 0   ;;  %s1971_s17 = smov 0  }
   0x7 LB: > { %s1475_s18 = sadd.s32 4294967295, %s1932_s17   ;;  %s1476_s19 = sadd.s32 4294967294, %s1932_s17   ;;  %s1932_s17 = sphi %s1971_s17, %s20_s17   ;;  %s1928_s16 = sphi %s1969_s16, %s2384_s16   ;;  %s1924_s15 = sphi %s1967_s15, %s2383_s15   ;;  %s1920_s14 = sphi %s1965_s14, %s2382_s14   ;;  %s1916_s13 = sphi %s1963_s13, %s2381_s13   ;;  %s1912_s12 = sphi %s1961_s12, %s2380_s12  }
   0x8   : > { %p54_p0 = scmp.ne.s32.totalorder %s1916_s13, %s1912_s12  ;;  %p1995_p1 = scmp.eq.s32.totalorder %s1475_s18, 0 }
   0x9   : > { %p1999_p2 = scmp.eq.s32.totalorder %s1475_s18, 1  ;;  %p131_p3 = scmp.eq.s32.totalorder %s1476_s19, 1 }
   0xa   : > { %s2365_s20 = scalar_select %p1995_p1, 1, 0 }
   0xb   : > { %s2366_s21 = scalar_select %p1999_p2, 1, 0 }
   0xc   : > { %p2005_p4 = por %p1995_p1, %p54_p0  ;;  %p1477_p5 = scmp.ge.s32.totalorder %s1932_s17, 1 }
   0xd   : > { %p2010_p6 = por %p131_p3, %p54_p0  ;;  %p138_p7 = scmp.lt.s32.totalorder %s1932_s17, 3 }
   0xe   : > { %s2367_s22 = scalar_select %p2005_p4, 1, 0 }
   0xf   : > { %s2368_s23 = scalar_select %p2010_p6, 1, 0 }
  0x10   : > { %p2015_p8 = pnand %p1477_p5, %p138_p7  ;;  %s1934_s25 = smov [#allocation6]  }
  0x11   : > { %s153_s26 = sshll.u32 %s1934_s25, 4  ;;  %s32_s28 = sadd.s32 1, %s1928_s16  ;;  %s154_s26 = int_to_ptr.vmem [resolvable:$true] %s153_s26 }
  0x12   : > { %s2369_s24 = scalar_select %p2015_p8, 1, 0 }
  0x13   : > { %p1679_p9 = pneg %p2015_p8  ;;  %s1788_s4 = scalar_lea.hbm %s2358_s1, 1024 }
  0x14   : > { %p1789_p12 = scmp.ne.s32.totalorder %s2358_s1, %s1788_s4  ;;  %p1795_p5 = scmp.lt.u32.totalorder %s1788_s4, %s2358_s1 }
  0x15   : > { %p2024_p11 = pnand %p1679_p9, %p1995_p1 }
  0x17   : > { %p1790_p13 = pneg %p2024_p11 }
  0x19   : > { %p1791_p0 = pnand %p1790_p13, %p1789_p12 }
  0x1b   : > { %p1792_p3 = pneg %p1791_p0 }
  0x1d   : > { %p1797_p7 = pnand %p1795_p5, %p1792_p3 }
  0x1f   : > { %1800 = shalt.err (!%p1797_p7)
}
  0x20   : > { %s1801_s9 = scalar_lea.vmem %s154_s26, 1024  ;;  %p1809_p1 = scmp.lt.s32.totalorder %s154_s26, %s154_s26 }
  0x21   : > { %p1802_p9 = scmp.ne.s32.totalorder %s154_s26, %s1801_s9  ;;  %p1810_p4 = scmp.lt.s32.totalorder %s1801_s9, %s1801_s9 }
  0x23   : > { %p1804_p10 = pnand %p1802_p9, %p1790_p13  ;;  %p1811_p8 = por %p1810_p4, %p1809_p1 }
  0x25   : > { %p1805_p6 = pneg %p1804_p10 }
  0x27   : > { %p1812_p2 = pnand %p1811_p8, %p1805_p6 }
  0x29   : > { %1815 = shalt.err (!%p1812_p2)
}
  0x2a   : > { %s1935_s10 = smov 64   ;;  %s1936_s11 = smov 4  }
  0x2b   : > { %1682 = dma.hbm_to_vmem [thread:$0]  (!%p2024_p11), %s2358_s1, 1024, %s154_s26, [#allocation7], %s1935_s10, %s1935_s10, %s1936_s11  }
  0x2c   : > { %p34_p1 = scmp.ge.s32.totalorder %s32_s28, 2  ;;  %s41_s25 = sadd.s32 1, %s1920_s14 }
  0x2d   : > { %p48_p2 = scmp.ne.s32.totalorder %s1920_s14, %s1916_s13  ;;  %p49_p4 = scmp.eq.s32.totalorder %s1932_s17, 0 }
  0x2e   : > { %s2386_s28 = smov (%p34_p1, %s32_s28), 0  ;;  %p2372_p8 = scmp.ne.s32.totalorder %s2366_s21, 0 }
  0x2f   : > { %p2054_p6 = por %p49_p4, %p48_p2  ;;  %s36_s30 = ssub.s32 %s1928_s16, %s2386_s28 }
  0x30   : > { %p2060_p10 = por %p2372_p8, %p48_p2  ;;  %p1692_p12 = scmp.lt.s32.totalorder %s1932_s17, 2 }
  0x31   : > { %p39_p11 = scmp.eq.s32.totalorder %s36_s30, 0  ;;  %s170_s26 = sand.u32 1, %s1920_s14  }
  0x32   : > { %s1480_s4 = sshll.u32 %s170_s26, 8  ;;  %s1533_s6 = sshll.u32 %s1928_s16, 12 }
  0x33   : > { %s2069_s5 = scalar_select %p39_p11, %s1920_s14, %s41_s25  }
  0x34   : > { %s2075_s9 = scalar_lea.hbm %s2357_s0, %s1533_s6  ;;  %s174_s21 = scalar_lea.vmem [#allocation3], %s1480_s4 }
  0x35   : > { %s182_s18 = sshll.u32 %s174_s21, 4  ;;  %p2081_p13 = pnand %p1692_p12, %p2054_p6  ;;  %s2077_s18 = int_to_ptr.vmem [resolvable:$true] %s182_s18 }
  0x36   : > { %s2085_s25 = scalar_lea.sflag [#allocation4], %s170_s26  ;;  %s1816_s30 = scalar_lea.hbm %s2075_s9, 4096 }
  0x37   : > { %p1817_p0 = scmp.ne.s32.totalorder %s2075_s9, %s1816_s30  ;;  %p1818_p3 = pneg %p2081_p13 }
  0x38   : > { %s1821_s29 = scalar_lea.hbm %s2357_s0, 8192  ;;  %p1822_p9 = scmp.lt.u32.totalorder %s2075_s9, %s2357_s0 }
  0x39   : > { %p1819_p5 = pnand %p1818_p3, %p1817_p0  ;;  %p1823_p1 = scmp.lt.u32.totalorder %s1821_s29, %s1816_s30 }
  0x3a   : > { %p1825_p4 = scmp.lt.u32.totalorder %s1816_s30, %s2075_s9 }
  0x3b   : > { %p1820_p7 = pneg %p1819_p5  ;;  %p1824_p2 = por %p1823_p1, %p1822_p9 }
  0x3d   : > { %p1826_p6 = por %p1825_p4, %p1824_p2 }
  0x3f   : > { %p1827_p8 = pnand %p1826_p6, %p1820_p7 }
  0x41   : > { %1830 = shalt.err (!%p1827_p8)
}
  0x42   : > { %s1831_s26 = scalar_lea.vmem %s2077_s18, 4096  ;;  %s1937_s21 = smov [#allocation3]  }
  0x43   : > { %p1832_p12 = scmp.ne.s32.totalorder %s2077_s18, %s1831_s26  ;;  %s1836_s4 = sshll.u32 %s1937_s21, 4  ;;  %s1837_s4 = int_to_ptr.vmem [resolvable:$false] %s1836_s4 }
  0x44   : > { %s1838_s6 = scalar_lea.vmem %s1837_s4, 8192  ;;  %p1839_p5 = scmp.lt.s32.totalorder %s2077_s18, %s1837_s4 }
  0x45   : > { %p1834_p11 = pnand %p1832_p12, %p1818_p3  ;;  %p1840_p9 = scmp.lt.s32.totalorder %s1838_s6, %s1831_s26 }
  0x47   : > { %p1835_p0 = pneg %p1834_p11  ;;  %p1841_p1 = por %p1840_p9, %p1839_p5 }
  0x49   : > { %p1842_p2 = pnand %p1841_p1, %p1835_p0 }
  0x4b   : > { %1845 = shalt.err (!%p1842_p2)
}
  0x4c   : > { %1686 = dma.hbm_to_vmem [thread:$0]  (!%p2081_p13), %s2075_s9, 4096, %s2077_s18, %s2085_s25, %s1935_s10, %s1935_s10, %s1936_s11  }
  0x4d   : > { %p2375_p3 = scmp.ne.s32.totalorder %s2369_s24, 0 }
  0x4e   : > { %s2119_s30 = sand.u32 (!%p2375_p3), 1, %s1916_s13   ;;  %p2376_p7 = scmp.ne.s32.totalorder (!%p2375_p3), %s2367_s22, 0 }
  0x4f   : > { %194 = sbr.rel (%p2375_p3) target bundleno = 413 (0x19d), region = 32  ;;  %s1484_s29 = sshll.u32 (!%p2375_p3), %s2119_s30, 8 }
  0x50   : > { %s197_s7 = scalar_lea.sflag (!%p2375_p3), [#allocation4], %s2119_s30  ;;  %s2123_s8 = scalar_lea.vmem (!%p2375_p3), [#allocation3], %s1484_s29 }
  0x56   : > { %1899 = dma.done.wait (%p2376_p7), %s197_s7, 4096  }
  0x57   : > { %1901 = vsyncadd (%p2376_p7), %s197_s7, 4294963200  ;;  %p2377_p13 = scmp.ne.s32.totalorder %s2365_s20, 0 }
  0x59   : > { %1903 = dma.done.wait (%p2377_p13), [#allocation7], 1024  }
  0x5a   : > { %1905 = vsyncadd (%p2377_p13), [#allocation7], 4294966272  ;;  %v1748_v0 = vld [vmem:[#allocation6] sm:$0xff]   ;;  %v1749_v1 = vld [vmem:[#allocation6 + $0x8] sm:$0xff]   ;;  %s1486_s24 = sshll.u32 %s2119_s30, 9  ;;  %s1534_s11 = sshll.u32 %s1924_s15, 13 }
  0x5b   : > { %1575 = vmatprep.subr.bf16.mxu0 %v1748_v0  ;;  %1655 = vmatprep.subr.bf16.mxu1 %v1748_v0  ;;  %v1750_v2 = vld [vmem:[#allocation6 + $0x10] sm:$0xff]   ;;  %v1751_v3 = vld [vmem:[#allocation6 + $0x18] sm:$0xff]   ;;  %v1756_v4 = vld [vmem:[%s2123_s8] sm:$0xff]   ;;  %s2179_s10 = scalar_lea.vmem [#allocation8], %s1486_s24  ;;  %s2300_s19 = scalar_lea.hbm %s2360_s3, %s1534_s11 }
  0x5c   : > { %1576 = vmatpush3.bf16.msra.mxu0 %v1748_v0  ;;  %1663 = vmatpush3.bf16.msra.mxu1 %v1748_v0  ;;  %v1757_v5 = vld [vmem:[%s2123_s8 + $0x80] sm:$0xff]   ;;  %v1753_v7 = vld [vmem:[#allocation6 + $0x28] sm:$0xff]   ;;  %v1754_v8 = vld [vmem:[#allocation6 + $0x30] sm:$0xff]   ;;  %s1380_s9 = sshll.u32 %s2179_s10, 4  ;;  %s1367_s25 = scalar_lea.sflag [#allocation5], %s2119_s30  ;;  %s2302_s9 = int_to_ptr.vmem [resolvable:$true] %s1380_s9 }
  0x5d   : > { %1577 = vmatprep.subr.bf16.mxu0 %v1749_v1  ;;  %1656 = vmatprep.subr.bf16.mxu1 %v1749_v1  ;;  %v1752_v6 = vld [vmem:[#allocation6 + $0x20] sm:$0xff]   ;;  %v1755_v9 = vld [vmem:[#allocation6 + $0x38] sm:$0xff]   ;;  %v1758_v10 = vld [vmem:[%s2123_s8 + $0x8] sm:$0xff]   ;;  %s1846_s26 = scalar_lea.vmem %s2302_s9, 8192  ;;  %s1938_s21 = smov [#allocation8]  }
  0x5e   : > { %1591 = vmatprep.mubr.bf16.mxu0 %v1756_v4  ;;  %1623 = vmatprep.mubr.bf16.mxu1 %v1757_v5  ;;  %v1759_v11 = vld [vmem:[%s2123_s8 + $0x88] sm:$0xff]   ;;  %v1760_v12 = vld [vmem:[%s2123_s8 + $0x10] sm:$0xff]   ;;  %v1762_v14 = vld [vmem:[%s2123_s8 + $0x18] sm:$0xff]   ;;  %p1847_p4 = scmp.ne.s32.totalorder %s2302_s9, %s1846_s26  ;;  %s1850_s4 = sshll.u32 %s1938_s21, 4  ;;  %s1851_s4 = int_to_ptr.vmem [resolvable:$false] %s1850_s4 }
  0x5f   : > { %v1761_v13 = vld [vmem:[%s2123_s8 + $0x90] sm:$0xff]   ;;  %v1763_v15 = vld [vmem:[%s2123_s8 + $0x98] sm:$0xff]   ;;  %v1764_v16 = vld [vmem:[%s2123_s8 + $0x20] sm:$0xff]   ;;  %s1852_s6 = scalar_lea.vmem %s1851_s4, 16384  ;;  %p1853_p12 = scmp.lt.s32.totalorder %s2302_s9, %s1851_s4 }
  0x60   : > { %1578 = vmatpush3.bf16.msra.mxu0 %v1749_v1  ;;  %1664 = vmatpush3.bf16.msra.mxu1 %v1749_v1  ;;  %v1765_v17 = vld [vmem:[%s2123_s8 + $0xa0] sm:$0xff]   ;;  %v1766_v18 = vld [vmem:[%s2123_s8 + $0x28] sm:$0xff]   ;;  %v1768_v20 = vld [vmem:[%s2123_s8 + $0x30] sm:$0xff]   ;;  %p1848_p6 = pnand %p1847_p4, %p2060_p10  ;;  %p1854_p11 = scmp.lt.s32.totalorder %s1852_s6, %s1846_s26 }
  0x61   : > { %1579 = vmatprep.subr.bf16.mxu0 %v1750_v2  ;;  %1657 = vmatprep.subr.bf16.mxu1 %v1750_v2  ;;  %v1767_v19 = vld [vmem:[%s2123_s8 + $0xa8] sm:$0xff]   ;;  %v1769_v21 = vld [vmem:[%s2123_s8 + $0xb0] sm:$0xff]   ;;  %v1770_v22 = vld [vmem:[%s2123_s8 + $0x38] sm:$0xff]  }
  0x62   : > { %v1771_v23 = vld [vmem:[%s2123_s8 + $0xb8] sm:$0xff]   ;;  %v1772_v24 = vld [vmem:[%s2123_s8 + $0x40] sm:$0xff]   ;;  %v1774_v26 = vld [vmem:[%s2123_s8 + $0x48] sm:$0xff]   ;;  %p1849_p8 = pneg %p1848_p6  ;;  %p1855_p0 = por %p1854_p11, %p1853_p12 }
  0x63   : > { %v1773_v25 = vld [vmem:[%s2123_s8 + $0xc0] sm:$0xff]   ;;  %v1775_v27 = vld [vmem:[%s2123_s8 + $0xc8] sm:$0xff]   ;;  %v1776_v28 = vld [vmem:[%s2123_s8 + $0x50] sm:$0xff]  }
  0x64   : > { %1580 = vmatpush3.bf16.msra.mxu0 %v1750_v2  ;;  %1665 = vmatpush3.bf16.msra.mxu1 %v1750_v2  ;;  %v1777_v29 = vld [vmem:[%s2123_s8 + $0xd0] sm:$0xff]   ;;  %v1778_v30 = vld [vmem:[%s2123_s8 + $0x58] sm:$0xff]   ;;  %v1780_v32 = vld [vmem:[%s2123_s8 + $0x60] sm:$0xff]   ;;  %p1856_p5 = pnand %p1855_p0, %p1849_p8 }
  0x65   : > { %1581 = vmatprep.subr.bf16.mxu0 %v1751_v3  ;;  %1658 = vmatprep.subr.bf16.mxu1 %v1751_v3  ;;  %v1779_v31 = vld [vmem:[%s2123_s8 + $0xd8] sm:$0xff]   ;;  %v1781_v33 = vld [vmem:[%s2123_s8 + $0xe0] sm:$0xff]   ;;  %v1782_v34 = vld [vmem:[%s2123_s8 + $0x68] sm:$0xff]  }
  0x66   : > { %v1783_v35 = vld [vmem:[%s2123_s8 + $0xe8] sm:$0xff]   ;;  %v1784_v36 = vld [vmem:[%s2123_s8 + $0x70] sm:$0xff]   ;;  %v1786_v38 = vld [vmem:[%s2123_s8 + $0x78] sm:$0xff]  }
  0x67   : > { %v1785_v37 = vld [vmem:[%s2123_s8 + $0xf0] sm:$0xff]   ;;  %v1787_v39 = vld [vmem:[%s2123_s8 + $0xf8] sm:$0xff]   ;;  %v2168_v40 = vld [vmem:[%s2359_s2] ss:$0 sm:$0xff] }
  0x68   : > { %1582 = vmatpush3.bf16.msra.mxu0 %v1751_v3  ;;  %1666 = vmatpush3.bf16.msra.mxu1 %v1751_v3 }
  0x69   : > { %1583 = vmatprep.subr.bf16.mxu0 %v1752_v6  ;;  %1659 = vmatprep.subr.bf16.mxu1 %v1752_v6 }
  0x6c   : > { %1584 = vmatpush3.bf16.msra.mxu0 %v1752_v6  ;;  %1667 = vmatpush3.bf16.msra.mxu1 %v1752_v6 }
  0x6d   : > { %1585 = vmatprep.subr.bf16.mxu0 %v1753_v7  ;;  %1660 = vmatprep.subr.bf16.mxu1 %v1753_v7 }
  0x70   : > { %1586 = vmatpush3.bf16.msra.mxu0 %v1753_v7  ;;  %1668 = vmatpush3.bf16.msra.mxu1 %v1753_v7 }
  0x71   : > { %1587 = vmatprep.subr.bf16.mxu0 %v1754_v8  ;;  %1661 = vmatprep.subr.bf16.mxu1 %v1754_v8 }
  0x74   : > { %1588 = vmatpush3.bf16.msra.mxu0 %v1754_v8  ;;  %1669 = vmatpush3.bf16.msra.mxu1 %v1754_v8 }
  0x75   : > { %1589 = vmatprep.subr.bf16.mxu0 %v1755_v9  ;;  %1662 = vmatprep.subr.bf16.mxu1 %v1755_v9 }
  0x78   : > { %1590 = vmatpush3.bf16.msra.mxu0 %v1755_v9  ;;  %1670 = vmatpush3.bf16.msra.mxu1 %v1755_v9 }
  0x7b   : > { %1592 = vmatmul.mubr.bf16.vlgmr.msra.gmra.mrb[0].mxu0 %v1758_v10  ;;  %1624 = vmatmul.mubr.bf16.vlgmr.msra.gmra.mrb[0].mxu1 %v1759_v11 }
  0x7c   : > { %1595 = vmatprep.mubr.bf16.mxu0 %v1760_v12  ;;  %1627 = vmatprep.mubr.bf16.mxu1 %v1761_v13 }
  0x83   : > { %1596 = vmatmul.mubr.bf16.gmra.mrb[4].mxu0 %v1762_v14  ;;  %1628 = vmatmul.mubr.bf16.gmra.mrb[4].mxu1 %v1763_v15 }
  0x84   : > { %1599 = vmatprep.mubr.bf16.mxu0 %v1764_v16  ;;  %1631 = vmatprep.mubr.bf16.mxu1 %v1765_v17 }
  0x8b   : > { %1600 = vmatmul.mubr.bf16.gmra.mrb[8].mxu0 %v1766_v18  ;;  %1632 = vmatmul.mubr.bf16.gmra.mrb[8].mxu1 %v1767_v19 }
  0x8c   : > { %1603 = vmatprep.mubr.bf16.mxu0 %v1768_v20  ;;  %1635 = vmatprep.mubr.bf16.mxu1 %v1769_v21 }
  0x93   : > { %1604 = vmatmul.mubr.bf16.gmra.mrb[12].mxu0 %v1770_v22  ;;  %1636 = vmatmul.mubr.bf16.gmra.mrb[12].mxu1 %v1771_v23 }
  0x94   : > { %1607 = vmatprep.mubr.bf16.mxu0 %v1772_v24  ;;  %1639 = vmatprep.mubr.bf16.mxu1 %v1773_v25 }
  0x9b   : > { %1608 = vmatmul.mubr.bf16.gmra.mrb[16].mxu0 %v1774_v26  ;;  %1640 = vmatmul.mubr.bf16.gmra.mrb[16].mxu1 %v1775_v27 }
  0x9c   : > { %1611 = vmatprep.mubr.bf16.mxu0 %v1776_v28  ;;  %1643 = vmatprep.mubr.bf16.mxu1 %v1777_v29 }
  0xa3   : > { %1612 = vmatmul.mubr.bf16.gmra.mrb[20].mxu0 %v1778_v30  ;;  %1644 = vmatmul.mubr.bf16.gmra.mrb[20].mxu1 %v1779_v31 }
  0xa4   : > { %1615 = vmatprep.mubr.bf16.mxu0 %v1780_v32  ;;  %1647 = vmatprep.mubr.bf16.mxu1 %v1781_v33 }
  0xab   : > { %1616 = vmatmul.mubr.bf16.gmra.mrb[24].mxu0 %v1782_v34  ;;  %1648 = vmatmul.mubr.bf16.gmra.mrb[24].mxu1 %v1783_v35 }
  0xac   : > { %1619 = vmatprep.mubr.bf16.mxu0 %v1784_v36  ;;  %1651 = vmatprep.mubr.bf16.mxu1 %v1785_v37 }
  0xb3   : > { %1620 = vmatmul.mubr.bf16.gmra.mrb[28].mxu0 %v1786_v38  ;;  %1652 = vmatmul.mubr.bf16.gmra.mrb[28].mxu1 %v1787_v39 }
 0x14e   : > { %v1593_v41 = vpop.f32.mrb[0].mxu0  ;;  %v1625_v42 = vpop.f32.mrb[0].mxu1 }
 0x14f   : > { %v1176_v43 = vadd.f32 %v1593_v41, %v2168_v40  ;;  %v1208_v44 = vadd.f32 %v1625_v42, %v2168_v40  ;;  %v717_v45 = vpop.f32.mrb[1].mxu0  ;;  %v845_v46 = vpop.f32.mrb[1].mxu1 }
 0x150   : > { %v1174_v47 = vadd.f32 %v2168_v40, %v717_v45  ;;  %v1206_v48 = vadd.f32 %v2168_v40, %v845_v46  ;;  %v1594_v49 = vpop.f32.mrb[2].mxu0  ;;  %v1626_v50 = vpop.f32.mrb[2].mxu1 }
 0x151   : > { %v1240_v51 = vmax.f32 %v1176_v43, 0.0  ;;  %v1272_v52 = vmax.f32 %v1208_v44, 0.0  ;;  %v1177_v53 = vadd.f32 %v1594_v49, %v2168_v40  ;;  %v1209_v54 = vadd.f32 %v1626_v50, %v2168_v40  ;;  %v720_v55 = vpop.f32.mrb[3].mxu0  ;;  %v848_v56 = vpop.f32.mrb[3].mxu1 }
 0x152   : > { %v1238_v57 = vmax.f32 %v1174_v47, 0.0  ;;  %v1270_v58 = vmax.f32 %v1206_v48, 0.0  ;;  %v1175_v59 = vadd.f32 %v2168_v40, %v720_v55  ;;  %v1207_v60 = vadd.f32 %v2168_v40, %v848_v56 }
 0x153   : > { %1304 = vst [vmem:[%s2179_s10 + $0x10] sm:$0xff] %v1240_v51  ;;  %1336 = vst [vmem:[%s2179_s10 + $0x110] sm:$0xff] %v1272_v52  ;;  %v1241_v61 = vmax.f32 %v1177_v53, 0.0  ;;  %v1273_v62 = vmax.f32 %v1209_v54, 0.0 }
 0x154   : > { %1302 = vst [vmem:[%s2179_s10] sm:$0xff] %v1238_v57  ;;  %1334 = vst [vmem:[%s2179_s10 + $0x100] sm:$0xff] %v1270_v58  ;;  %v1239_v63 = vmax.f32 %v1175_v59, 0.0  ;;  %v1271_v0 = vmax.f32 %v1207_v60, 0.0 }
 0x155   : > { %1305 = vst [vmem:[%s2179_s10 + $0x18] sm:$0xff] %v1241_v61  ;;  %1337 = vst [vmem:[%s2179_s10 + $0x118] sm:$0xff] %v1273_v62 }
 0x156   : > { %1303 = vst [vmem:[%s2179_s10 + $0x8] sm:$0xff] %v1239_v63  ;;  %1335 = vst [vmem:[%s2179_s10 + $0x108] sm:$0xff] %v1271_v0  ;;  %v1597_v1 = vpop.f32.mrb[4].mxu0  ;;  %v1629_v2 = vpop.f32.mrb[4].mxu1 }
 0x157   : > { %v1180_v3 = vadd.f32 %v1597_v1, %v2168_v40  ;;  %v1212_v4 = vadd.f32 %v1629_v2, %v2168_v40  ;;  %v733_v5 = vpop.f32.mrb[5].mxu0  ;;  %v861_v6 = vpop.f32.mrb[5].mxu1 }
 0x158   : > { %v1178_v7 = vadd.f32 %v2168_v40, %v733_v5  ;;  %v1210_v8 = vadd.f32 %v2168_v40, %v861_v6  ;;  %v1598_v9 = vpop.f32.mrb[6].mxu0  ;;  %v1630_v10 = vpop.f32.mrb[6].mxu1 }
 0x159   : > { %v1244_v11 = vmax.f32 %v1180_v3, 0.0  ;;  %v1276_v12 = vmax.f32 %v1212_v4, 0.0  ;;  %v1181_v13 = vadd.f32 %v1598_v9, %v2168_v40  ;;  %v1213_v14 = vadd.f32 %v1630_v10, %v2168_v40  ;;  %v736_v15 = vpop.f32.mrb[7].mxu0  ;;  %v864_v16 = vpop.f32.mrb[7].mxu1 }
 0x15a   : > { %v1242_v17 = vmax.f32 %v1178_v7, 0.0  ;;  %v1274_v18 = vmax.f32 %v1210_v8, 0.0  ;;  %v1179_v19 = vadd.f32 %v2168_v40, %v736_v15  ;;  %v1211_v20 = vadd.f32 %v2168_v40, %v864_v16 }
 0x15b   : > { %1308 = vst [vmem:[%s2179_s10 + $0x30] sm:$0xff] %v1244_v11  ;;  %1340 = vst [vmem:[%s2179_s10 + $0x130] sm:$0xff] %v1276_v12  ;;  %v1245_v21 = vmax.f32 %v1181_v13, 0.0  ;;  %v1277_v22 = vmax.f32 %v1213_v14, 0.0 }
 0x15c   : > { %1306 = vst [vmem:[%s2179_s10 + $0x20] sm:$0xff] %v1242_v17  ;;  %1338 = vst [vmem:[%s2179_s10 + $0x120] sm:$0xff] %v1274_v18  ;;  %v1243_v23 = vmax.f32 %v1179_v19, 0.0  ;;  %v1275_v24 = vmax.f32 %v1211_v20, 0.0 }
 0x15d   : > { %1309 = vst [vmem:[%s2179_s10 + $0x38] sm:$0xff] %v1245_v21  ;;  %1341 = vst [vmem:[%s2179_s10 + $0x138] sm:$0xff] %v1277_v22 }
 0x15e   : > { %1307 = vst [vmem:[%s2179_s10 + $0x28] sm:$0xff] %v1243_v23  ;;  %1339 = vst [vmem:[%s2179_s10 + $0x128] sm:$0xff] %v1275_v24  ;;  %v1601_v25 = vpop.f32.mrb[8].mxu0  ;;  %v1633_v26 = vpop.f32.mrb[8].mxu1 }
 0x15f   : > { %v1184_v27 = vadd.f32 %v1601_v25, %v2168_v40  ;;  %v1216_v28 = vadd.f32 %v1633_v26, %v2168_v40  ;;  %v749_v29 = vpop.f32.mrb[9].mxu0  ;;  %v877_v30 = vpop.f32.mrb[9].mxu1 }
 0x160   : > { %v1182_v31 = vadd.f32 %v2168_v40, %v749_v29  ;;  %v1214_v32 = vadd.f32 %v2168_v40, %v877_v30  ;;  %v1602_v33 = vpop.f32.mrb[10].mxu0  ;;  %v1634_v34 = vpop.f32.mrb[10].mxu1 }
 0x161   : > { %v1248_v35 = vmax.f32 %v1184_v27, 0.0  ;;  %v1280_v36 = vmax.f32 %v1216_v28, 0.0  ;;  %v1185_v37 = vadd.f32 %v1602_v33, %v2168_v40  ;;  %v1217_v38 = vadd.f32 %v1634_v34, %v2168_v40  ;;  %v752_v39 = vpop.f32.mrb[11].mxu0  ;;  %v880_v41 = vpop.f32.mrb[11].mxu1 }
 0x162   : > { %v1246_v42 = vmax.f32 %v1182_v31, 0.0  ;;  %v1278_v43 = vmax.f32 %v1214_v32, 0.0  ;;  %v1183_v44 = vadd.f32 %v2168_v40, %v752_v39  ;;  %v1215_v45 = vadd.f32 %v2168_v40, %v880_v41 }
 0x163   : > { %1312 = vst [vmem:[%s2179_s10 + $0x50] sm:$0xff] %v1248_v35  ;;  %1344 = vst [vmem:[%s2179_s10 + $0x150] sm:$0xff] %v1280_v36  ;;  %v1249_v46 = vmax.f32 %v1185_v37, 0.0  ;;  %v1281_v47 = vmax.f32 %v1217_v38, 0.0 }
 0x164   : > { %1310 = vst [vmem:[%s2179_s10 + $0x40] sm:$0xff] %v1246_v42  ;;  %1342 = vst [vmem:[%s2179_s10 + $0x140] sm:$0xff] %v1278_v43  ;;  %v1247_v48 = vmax.f32 %v1183_v44, 0.0  ;;  %v1279_v49 = vmax.f32 %v1215_v45, 0.0 }
 0x165   : > { %1313 = vst [vmem:[%s2179_s10 + $0x58] sm:$0xff] %v1249_v46  ;;  %1345 = vst [vmem:[%s2179_s10 + $0x158] sm:$0xff] %v1281_v47 }
 0x166   : > { %1311 = vst [vmem:[%s2179_s10 + $0x48] sm:$0xff] %v1247_v48  ;;  %1343 = vst [vmem:[%s2179_s10 + $0x148] sm:$0xff] %v1279_v49  ;;  %v1605_v50 = vpop.f32.mrb[12].mxu0  ;;  %v1637_v51 = vpop.f32.mrb[12].mxu1 }
 0x167   : > { %v1188_v52 = vadd.f32 %v1605_v50, %v2168_v40  ;;  %v1220_v53 = vadd.f32 %v1637_v51, %v2168_v40  ;;  %v765_v54 = vpop.f32.mrb[13].mxu0  ;;  %v893_v55 = vpop.f32.mrb[13].mxu1 }
 0x168   : > { %v1186_v56 = vadd.f32 %v2168_v40, %v765_v54  ;;  %v1218_v57 = vadd.f32 %v2168_v40, %v893_v55  ;;  %v1606_v58 = vpop.f32.mrb[14].mxu0  ;;  %v1638_v59 = vpop.f32.mrb[14].mxu1 }
 0x169   : > { %v1252_v60 = vmax.f32 %v1188_v52, 0.0  ;;  %v1284_v61 = vmax.f32 %v1220_v53, 0.0  ;;  %v1189_v62 = vadd.f32 %v1606_v58, %v2168_v40  ;;  %v1221_v63 = vadd.f32 %v1638_v59, %v2168_v40  ;;  %v768_v0 = vpop.f32.mrb[15].mxu0  ;;  %v896_v1 = vpop.f32.mrb[15].mxu1 }
 0x16a   : > { %v1250_v2 = vmax.f32 %v1186_v56, 0.0  ;;  %v1282_v3 = vmax.f32 %v1218_v57, 0.0  ;;  %v1187_v4 = vadd.f32 %v2168_v40, %v768_v0  ;;  %v1219_v5 = vadd.f32 %v2168_v40, %v896_v1 }
 0x16b   : > { %1316 = vst [vmem:[%s2179_s10 + $0x70] sm:$0xff] %v1252_v60  ;;  %1348 = vst [vmem:[%s2179_s10 + $0x170] sm:$0xff] %v1284_v61  ;;  %v1253_v6 = vmax.f32 %v1189_v62, 0.0  ;;  %v1285_v7 = vmax.f32 %v1221_v63, 0.0 }
 0x16c   : > { %1314 = vst [vmem:[%s2179_s10 + $0x60] sm:$0xff] %v1250_v2  ;;  %1346 = vst [vmem:[%s2179_s10 + $0x160] sm:$0xff] %v1282_v3  ;;  %v1251_v8 = vmax.f32 %v1187_v4, 0.0  ;;  %v1283_v9 = vmax.f32 %v1219_v5, 0.0 }
 0x16d   : > { %1317 = vst [vmem:[%s2179_s10 + $0x78] sm:$0xff] %v1253_v6  ;;  %1349 = vst [vmem:[%s2179_s10 + $0x178] sm:$0xff] %v1285_v7 }
 0x16e   : > { %1315 = vst [vmem:[%s2179_s10 + $0x68] sm:$0xff] %v1251_v8  ;;  %1347 = vst [vmem:[%s2179_s10 + $0x168] sm:$0xff] %v1283_v9  ;;  %v1609_v10 = vpop.f32.mrb[16].mxu0  ;;  %v1641_v11 = vpop.f32.mrb[16].mxu1 }
 0x16f   : > { %v1192_v12 = vadd.f32 %v1609_v10, %v2168_v40  ;;  %v1224_v13 = vadd.f32 %v1641_v11, %v2168_v40  ;;  %v781_v14 = vpop.f32.mrb[17].mxu0  ;;  %v909_v15 = vpop.f32.mrb[17].mxu1 }
 0x170   : > { %v1190_v16 = vadd.f32 %v2168_v40, %v781_v14  ;;  %v1222_v17 = vadd.f32 %v2168_v40, %v909_v15  ;;  %v1610_v18 = vpop.f32.mrb[18].mxu0  ;;  %v1642_v19 = vpop.f32.mrb[18].mxu1 }
 0x171   : > { %v1256_v20 = vmax.f32 %v1192_v12, 0.0  ;;  %v1288_v21 = vmax.f32 %v1224_v13, 0.0  ;;  %v1193_v22 = vadd.f32 %v1610_v18, %v2168_v40  ;;  %v1225_v23 = vadd.f32 %v1642_v19, %v2168_v40  ;;  %v784_v24 = vpop.f32.mrb[19].mxu0  ;;  %v912_v25 = vpop.f32.mrb[19].mxu1 }
 0x172   : > { %v1254_v26 = vmax.f32 %v1190_v16, 0.0  ;;  %v1286_v27 = vmax.f32 %v1222_v17, 0.0  ;;  %v1191_v28 = vadd.f32 %v2168_v40, %v784_v24  ;;  %v1223_v29 = vadd.f32 %v2168_v40, %v912_v25 }
 0x173   : > { %1320 = vst [vmem:[%s2179_s10 + $0x90] sm:$0xff] %v1256_v20  ;;  %1352 = vst [vmem:[%s2179_s10 + $0x190] sm:$0xff] %v1288_v21  ;;  %v1257_v30 = vmax.f32 %v1193_v22, 0.0  ;;  %v1289_v31 = vmax.f32 %v1225_v23, 0.0 }
 0x174   : > { %1318 = vst [vmem:[%s2179_s10 + $0x80] sm:$0xff] %v1254_v26  ;;  %1350 = vst [vmem:[%s2179_s10 + $0x180] sm:$0xff] %v1286_v27  ;;  %v1255_v32 = vmax.f32 %v1191_v28, 0.0  ;;  %v1287_v33 = vmax.f32 %v1223_v29, 0.0 }
 0x175   : > { %1321 = vst [vmem:[%s2179_s10 + $0x98] sm:$0xff] %v1257_v30  ;;  %1353 = vst [vmem:[%s2179_s10 + $0x198] sm:$0xff] %v1289_v31 }
 0x176   : > { %1319 = vst [vmem:[%s2179_s10 + $0x88] sm:$0xff] %v1255_v32  ;;  %1351 = vst [vmem:[%s2179_s10 + $0x188] sm:$0xff] %v1287_v33  ;;  %v1613_v34 = vpop.f32.mrb[20].mxu0  ;;  %v1645_v35 = vpop.f32.mrb[20].mxu1 }
 0x177   : > { %v1196_v36 = vadd.f32 %v1613_v34, %v2168_v40  ;;  %v1228_v37 = vadd.f32 %v1645_v35, %v2168_v40  ;;  %v797_v38 = vpop.f32.mrb[21].mxu0  ;;  %v925_v39 = vpop.f32.mrb[21].mxu1 }
 0x178   : > { %v1194_v41 = vadd.f32 %v2168_v40, %v797_v38  ;;  %v1226_v42 = vadd.f32 %v2168_v40, %v925_v39  ;;  %v1614_v43 = vpop.f32.mrb[22].mxu0  ;;  %v1646_v44 = vpop.f32.mrb[22].mxu1 }
 0x179   : > { %v1260_v45 = vmax.f32 %v1196_v36, 0.0  ;;  %v1292_v46 = vmax.f32 %v1228_v37, 0.0  ;;  %v1197_v47 = vadd.f32 %v1614_v43, %v2168_v40  ;;  %v1229_v48 = vadd.f32 %v1646_v44, %v2168_v40  ;;  %v800_v49 = vpop.f32.mrb[23].mxu0  ;;  %v928_v50 = vpop.f32.mrb[23].mxu1 }
 0x17a   : > { %v1258_v51 = vmax.f32 %v1194_v41, 0.0  ;;  %v1290_v52 = vmax.f32 %v1226_v42, 0.0  ;;  %v1195_v53 = vadd.f32 %v2168_v40, %v800_v49  ;;  %v1227_v54 = vadd.f32 %v2168_v40, %v928_v50 }
 0x17b   : > { %1324 = vst [vmem:[%s2179_s10 + $0xb0] sm:$0xff] %v1260_v45  ;;  %1356 = vst [vmem:[%s2179_s10 + $0x1b0] sm:$0xff] %v1292_v46  ;;  %v1261_v55 = vmax.f32 %v1197_v47, 0.0  ;;  %v1293_v56 = vmax.f32 %v1229_v48, 0.0 }
 0x17c   : > { %1322 = vst [vmem:[%s2179_s10 + $0xa0] sm:$0xff] %v1258_v51  ;;  %1354 = vst [vmem:[%s2179_s10 + $0x1a0] sm:$0xff] %v1290_v52  ;;  %v1259_v57 = vmax.f32 %v1195_v53, 0.0  ;;  %v1291_v58 = vmax.f32 %v1227_v54, 0.0 }
 0x17d   : > { %1325 = vst [vmem:[%s2179_s10 + $0xb8] sm:$0xff] %v1261_v55  ;;  %1357 = vst [vmem:[%s2179_s10 + $0x1b8] sm:$0xff] %v1293_v56 }
 0x17e   : > { %1323 = vst [vmem:[%s2179_s10 + $0xa8] sm:$0xff] %v1259_v57  ;;  %1355 = vst [vmem:[%s2179_s10 + $0x1a8] sm:$0xff] %v1291_v58  ;;  %v1617_v59 = vpop.f32.mrb[24].mxu0  ;;  %v1649_v60 = vpop.f32.mrb[24].mxu1 }
 0x17f   : > { %v1200_v61 = vadd.f32 %v1617_v59, %v2168_v40  ;;  %v1232_v62 = vadd.f32 %v1649_v60, %v2168_v40  ;;  %v813_v63 = vpop.f32.mrb[25].mxu0  ;;  %v941_v0 = vpop.f32.mrb[25].mxu1 }
 0x180   : > { %v1198_v1 = vadd.f32 %v2168_v40, %v813_v63  ;;  %v1230_v2 = vadd.f32 %v2168_v40, %v941_v0  ;;  %v1618_v3 = vpop.f32.mrb[26].mxu0  ;;  %v1650_v4 = vpop.f32.mrb[26].mxu1 }
 0x181   : > { %v1264_v5 = vmax.f32 %v1200_v61, 0.0  ;;  %v1296_v6 = vmax.f32 %v1232_v62, 0.0  ;;  %v1201_v7 = vadd.f32 %v1618_v3, %v2168_v40  ;;  %v1233_v8 = vadd.f32 %v1650_v4, %v2168_v40  ;;  %v816_v9 = vpop.f32.mrb[27].mxu0  ;;  %v944_v10 = vpop.f32.mrb[27].mxu1 }
 0x182   : > { %v1262_v11 = vmax.f32 %v1198_v1, 0.0  ;;  %v1294_v12 = vmax.f32 %v1230_v2, 0.0  ;;  %v1199_v13 = vadd.f32 %v2168_v40, %v816_v9  ;;  %v1231_v14 = vadd.f32 %v2168_v40, %v944_v10 }
 0x183   : > { %1328 = vst [vmem:[%s2179_s10 + $0xd0] sm:$0xff] %v1264_v5  ;;  %1360 = vst [vmem:[%s2179_s10 + $0x1d0] sm:$0xff] %v1296_v6  ;;  %v1265_v15 = vmax.f32 %v1201_v7, 0.0  ;;  %v1297_v16 = vmax.f32 %v1233_v8, 0.0 }
 0x184   : > { %1326 = vst [vmem:[%s2179_s10 + $0xc0] sm:$0xff] %v1262_v11  ;;  %1358 = vst [vmem:[%s2179_s10 + $0x1c0] sm:$0xff] %v1294_v12  ;;  %v1263_v17 = vmax.f32 %v1199_v13, 0.0  ;;  %v1295_v18 = vmax.f32 %v1231_v14, 0.0 }
 0x185   : > { %1329 = vst [vmem:[%s2179_s10 + $0xd8] sm:$0xff] %v1265_v15  ;;  %1361 = vst [vmem:[%s2179_s10 + $0x1d8] sm:$0xff] %v1297_v16 }
 0x186   : > { %1327 = vst [vmem:[%s2179_s10 + $0xc8] sm:$0xff] %v1263_v17  ;;  %1359 = vst [vmem:[%s2179_s10 + $0x1c8] sm:$0xff] %v1295_v18  ;;  %v1621_v19 = vpop.f32.mrb[28].mxu0  ;;  %v1653_v20 = vpop.f32.mrb[28].mxu1 }
 0x187   : > { %v1204_v21 = vadd.f32 %v1621_v19, %v2168_v40  ;;  %v1236_v22 = vadd.f32 %v1653_v20, %v2168_v40  ;;  %v829_v23 = vpop.f32.mrb[29].mxu0  ;;  %v957_v24 = vpop.f32.mrb[29].mxu1 }
 0x188   : > { %v1202_v25 = vadd.f32 %v2168_v40, %v829_v23  ;;  %v1234_v26 = vadd.f32 %v2168_v40, %v957_v24  ;;  %v1622_v27 = vpop.f32.mrb[30].mxu0  ;;  %v1654_v28 = vpop.f32.mrb[30].mxu1 }
 0x189   : > { %v1268_v29 = vmax.f32 %v1204_v21, 0.0  ;;  %v1300_v30 = vmax.f32 %v1236_v22, 0.0  ;;  %v1205_v31 = vadd.f32 %v1622_v27, %v2168_v40  ;;  %v1237_v32 = vadd.f32 %v1654_v28, %v2168_v40  ;;  %v832_v33 = vpop.f32.mrb[31].mxu0  ;;  %v960_v34 = vpop.f32.mrb[31].mxu1 }
 0x18a   : > { %v1266_v35 = vmax.f32 %v1202_v25, 0.0  ;;  %v1298_v36 = vmax.f32 %v1234_v26, 0.0  ;;  %v1203_v37 = vadd.f32 %v2168_v40, %v832_v33  ;;  %v1235_v38 = vadd.f32 %v2168_v40, %v960_v34 }
 0x18b   : > { %1332 = vst [vmem:[%s2179_s10 + $0xf0] sm:$0xff] %v1268_v29  ;;  %1364 = vst [vmem:[%s2179_s10 + $0x1f0] sm:$0xff] %v1300_v30  ;;  %v1269_v39 = vmax.f32 %v1205_v31, 0.0  ;;  %v1301_v41 = vmax.f32 %v1237_v32, 0.0 }
 0x18c   : > { %1330 = vst [vmem:[%s2179_s10 + $0xe0] sm:$0xff] %v1266_v35  ;;  %1362 = vst [vmem:[%s2179_s10 + $0x1e0] sm:$0xff] %v1298_v36  ;;  %v1267_v42 = vmax.f32 %v1203_v37, 0.0  ;;  %v1299_v43 = vmax.f32 %v1235_v38, 0.0 }
 0x18d   : > { %1333 = vst [vmem:[%s2179_s10 + $0xf8] sm:$0xff] %v1269_v39  ;;  %1365 = vst [vmem:[%s2179_s10 + $0x1f8] sm:$0xff] %v1301_v41 }
 0x18e   : > { %1331 = vst [vmem:[%s2179_s10 + $0xe8] sm:$0xff] %v1267_v42  ;;  %1363 = vst [vmem:[%s2179_s10 + $0x1e8] sm:$0xff] %v1299_v43 }
 0x18f   : > { %1859 = shalt.err (!%p1856_p5)
}
 0x190   : > { %s1860_s29 = scalar_lea.hbm %s2300_s19, 8192  ;;  %s1864_s20 = scalar_lea.hbm %s2360_s3, 16384 }
 0x191   : > { %p1861_p9 = scmp.ne.s32.totalorder %s2300_s19, %s1860_s29  ;;  %p1865_p3 = scmp.lt.u32.totalorder %s2300_s19, %s2360_s3 }
 0x192   : > { %p1866_p7 = scmp.lt.u32.totalorder %s1864_s20, %s1860_s29  ;;  %p1868_p4 = scmp.lt.u32.totalorder %s1860_s29, %s2300_s19 }
 0x193   : > { %p1862_p1 = pnand %p1861_p9, %p2060_p10 }
 0x194   : > { %p1867_p13 = por %p1866_p7, %p1865_p3 }
 0x195   : > { %p1863_p2 = pneg %p1862_p1 }
 0x196   : > { %p1869_p6 = por %p1868_p4, %p1867_p13 }
 0x198   : > { %p1870_p8 = pnand %p1869_p6, %p1863_p2 }
 0x19a   : > { %1873 = shalt.err (!%p1870_p8)
}
 0x19b   : > { %s1939_s10 = smov 128   ;;  %s1940_s11 = smov 8  }
 0x19c   : > { %1677 = dma.vmem_to_hbm [thread:$0]  (%p2060_p10), %s2302_s9, 8192, %s2300_s19, %s1367_s25, %s1939_s10, %s1939_s10, %s1940_s11  }
 0x19d PF: > { %s1395_s15 = sand.u32 1, %s1912_s12   ;;  %p2378_p12 = scmp.ne.s32.totalorder %s2368_s23, 0 }
 0x19e   : > { %p2379_p11 = scmp.ge.s32.totalorder %s1932_s17, 2  ;;  %s1396_s18 = scalar_lea.sflag [#allocation5], %s1395_s15 }
 0x1a0   : > { %p1688_p0 = pnand %p2379_p11, %p2378_p12 }
 0x1a2   : > { %1907 = dma.done.wait (!%p1688_p0), %s1396_s18, 8192  }
 0x1a3   : > { %1909 = vsyncadd (!%p1688_p0), %s1396_s18, 4294959104  ;;  %s20_s17 = sadd.s32 1, %s1932_s17   ;;  %s2380_s12 = smov %s1916_s13 }
 0x1a4   : > { %p17_p5 = scmp.ge.s32.totalorder %s20_s17, 4   ;;  %s2381_s13 = smov %s1920_s14 }
 0x1a5   : > { %s2382_s14 = smov %s2069_s5  ;;  %s2383_s15 = smov %s1928_s16 }
 0x1a6   : > { %s2384_s16 = smov %s2386_s28  ;;  %19 = sbr.rel (!%p17_p5) target bundleno = 7 (0x7), region = 90 }
 0x1ad   :  { %1401 = vsyncpa [#allocation4], 1 }
 0x1ae   :  { %1403 = vsyncpa [#allocation4 + $0x1], 1 }
 0x1af   :  { %1404 = vsyncpa [#allocation7], 1 }
 0x1b0   :  { %1405 = vsyncpa [#allocation5], 1 }
 0x1b1   :  { %1407 = vsyncpa [#allocation5 + $0x1], 1 }

</bundles_post_ra>
